<compile_context>
chip_gen: v7x
topology: tpu7x:2x2x1
jax: 0.10.0
libtpu: 0.0.40
codegen_flags: <defaults>
</compile_context>

<pallas_src>
import jax
import jax.numpy as jnp
from jax.experimental import pallas as pl
from jax.experimental.pallas import tpu as pltpu

_LANE = 128          # hidden dim padded to the lane width
_MAX_TILE_B = 4096   # batch tile cap (per-tile VMEM ~8 MiB incl. f32 intermediates)


def _cdiv(a, b):
    return (a + b - 1) // b


def _round_up(x, m):
    return _cdiv(x, m) * m


def _num_tensorcores():
    """Best-effort detection of TensorCores per chip (v7x has 2)."""
    try:
        kind = jax.devices()[0].device_kind.lower()
    except Exception:
        return 1
    return 2 if "v7" in kind else 1


def _double_critic_kernel(x_ref, w1_ref, w2_ref, w3_ref, b_ref, q_ref):
    # Layer 1: one fused K=in_dim matmul (bf16 operands, f32 accumulate), f32 ReLU.
    x = x_ref[...].astype(jnp.bfloat16)
    h1 = jnp.dot(x, w1_ref[...], preferred_element_type=jnp.float32)
    h1 = jnp.maximum(h1 + b_ref[0:1, :], 0.0)

    # Layer 2: H x H matmul, f32 bias + ReLU.
    h2 = jnp.dot(h1.astype(jnp.bfloat16), w2_ref[...],
                 preferred_element_type=jnp.float32)
    h2 = jnp.maximum(h2 + b_ref[1:2, :], 0.0)

    # Layer 3 (out_features=1): contract the hidden dim with w3 stored as an
    # (8, H) block (row 0 = real weights, rows 1..7 zero) so the MXU produces a
    # lane-major (8, tile_b) result directly -> lane-dense output stores, no
    # (tile_b, 1) masked stores and no XLU transpose of the q column.
    q8 = jax.lax.dot_general(
        w3_ref[...], h2.astype(jnp.bfloat16),
        dimension_numbers=(((1,), (1,)), ((), ())),
        preferred_element_type=jnp.float32)               # (8, tile_b)
    q = q8[0:1, :] + b_ref[2:3, 0:1]                      # (1, tile_b), f32
    q_ref[...] = q.reshape(q_ref.shape)


def double_critic_forward(low_dim_states, social_vehicles, action, params):
    """Mirrors DoubleCritic.forward(state, action, training=False) with
    social_feature_encoder=None.  Returns (q1, q2); the reference module uses
    self.q1 for both heads, so q2 is the same tensor as q1."""
    B = low_dim_states.shape[0]
    # social_feature = cat([e.reshape(1, -1) for e in social_vehicles], 0)
    social_feature = social_vehicles.reshape(B, -1).astype(jnp.float32)

    # Fused concat: x = [action, low_dim_states, social_feature]  (cheap, ~128 B/row)
    x = jnp.concatenate(
        [action.astype(jnp.float32), low_dim_states.astype(jnp.float32),
         social_feature], axis=1)
    in_dim = x.shape[1]
    H = params["w2"].shape[0]  # lane-padded hidden width

    # Batch tiling: balanced tiles; >=2 parallel steps on multi-TensorCore chips.
    min_tiles = _num_tensorcores() if B >= 16 else 1
    num_tiles = max(_cdiv(B, _MAX_TILE_B), min_tiles)
    tile_b = _round_up(_cdiv(B, num_tiles), 8)
    b_pad = tile_b * num_tiles
    if b_pad != B:
        x = jnp.pad(x, ((0, b_pad - B), (0, 0)))

    out = pl.pallas_call(
        _double_critic_kernel,
        out_shape=jax.ShapeDtypeStruct((num_tiles, 1, tile_b), jnp.float32),
        grid=(num_tiles,),
        in_specs=[
            pl.BlockSpec((tile_b, in_dim), lambda i: (i, 0)),   # activation block
            pl.BlockSpec((in_dim, H), lambda i: (0, 0)),        # W1 (resident)
            pl.BlockSpec((H, H), lambda i: (0, 0)),             # W2 (resident)
            pl.BlockSpec((8, H), lambda i: (0, 0)),             # W3 rows (resident)
            pl.BlockSpec((3, H), lambda i: (0, 0)),             # packed biases (f32)
        ],
        out_specs=pl.BlockSpec((1, 1, tile_b), lambda i: (i, 0, 0)),
        compiler_params=pltpu.CompilerParams(
            dimension_semantics=("parallel",)),
    )(x, params["w1"], params["w2"], params["w3"], params["biases"])

    q1 = out.reshape(b_pad, 1)[:B]
    return q1, q1   # reference module: q2 = self.q1(action_state)


def init_params(key, action_size, low_dim, social_dim, hidden_units=64):
    """Synthetic PyTorch-style (U[-1/sqrt(fan_in), 1/sqrt(fan_in)]) init for the q1
    MLP in kernel-ready layout:
      * single W1 of shape (in_dim, H),
      * hidden dim zero-padded to the 128-lane width (output-identical),
      * W1/W2/W3 stored bf16 (MXU operands); biases packed into one (3, H) f32 array,
      * W3 stored as an (8, H) block (row 0 real, rest zero) for the lane-major head.
    NOTE: the PyTorch module also creates q2 parameters, but forward() never uses
    them (q2 = self.q1(action_state)), so they are omitted here."""
    in_dim = action_size + low_dim + social_dim
    H = _round_up(hidden_units, _LANE)
    pad_h = H - hidden_units
    keys = jax.random.split(key, 6)

    def linear(kw, kb, fan_in, fan_out):
        bound = 1.0 / jnp.sqrt(jnp.asarray(fan_in, jnp.float32))
        w = jax.random.uniform(kw, (fan_in, fan_out), jnp.float32, -bound, bound)
        b = jax.random.uniform(kb, (fan_out,), jnp.float32, -bound, bound)
        return w, b

    w1, b1 = linear(keys[0], keys[1], in_dim, hidden_units)
    w2, b2 = linear(keys[2], keys[3], hidden_units, hidden_units)
    w3, b3 = linear(keys[4], keys[5], hidden_units, 1)

    # Zero-pad hidden dim to H (identity: padded units -> ReLU(0) = 0 -> no effect).
    w1 = jnp.pad(w1, ((0, 0), (0, pad_h)))
    b1 = jnp.pad(b1, ((0, pad_h),))
    w2 = jnp.pad(w2, ((0, pad_h), (0, pad_h)))
    b2 = jnp.pad(b2, ((0, pad_h),))
    w3_block = jnp.zeros((8, H), jnp.float32).at[0, :hidden_units].set(w3[:, 0])

    biases = jnp.stack([b1, b2, jnp.pad(b3, ((0, H - 1),))], axis=0)  # (3, H) f32

    return {
        "w1": w1.astype(jnp.bfloat16),
        "w2": w2.astype(jnp.bfloat16),
        "w3": w3_block.astype(jnp.bfloat16),
        "biases": biases,
    }


if __name__ == "__main__":
    # Small, module-consistent shapes.
    B = 8
    action_size = 2
    low_dim = 10
    n_veh, veh_feat = 5, 4                       # social vehicles per sample
    social_dim = n_veh * veh_feat                # 20
    hidden_units = 64

    key = jax.random.PRNGKey(0)
    k_low, k_soc, k_act, k_par = jax.random.split(key, 4)
    low_dim_states = jax.random.normal(k_low, (B, low_dim), jnp.float32)
    social_vehicles = jax.random.normal(k_soc, (B, n_veh, veh_feat), jnp.float32)
    action = jax.random.normal(k_act, (B, action_size), jnp.float32)

    params = init_params(k_par, action_size, low_dim, social_dim, hidden_units)

    q1, q2 = double_critic_forward(low_dim_states, social_vehicles, action, params)
    jax.block_until_ready((q1, q2))

    # Pure-JAX reference with the same bf16-operand / f32-accumulate quantization.
    x = jnp.concatenate(
        [action, low_dim_states, social_vehicles.reshape(B, -1)], axis=1)
    xb = x.astype(jnp.bfloat16)
    h1 = jnp.maximum(
        jnp.dot(xb, params["w1"], preferred_element_type=jnp.float32)
        + params["biases"][0], 0.0)
    h2 = jnp.maximum(
        jnp.dot(h1.astype(jnp.bfloat16), params["w2"],
                preferred_element_type=jnp.float32) + params["biases"][1], 0.0)
    q_ref = (jnp.dot(h2.astype(jnp.bfloat16), params["w3"][0:1, :].T,
                     preferred_element_type=jnp.float32)
             + params["biases"][2, 0])

    assert q1.shape == (B, 1) and q2.shape == (B, 1)
    assert jnp.allclose(q1, q_ref, atol=1e-2, rtol=1e-2), "q1 mismatch vs reference"
    assert jnp.allclose(q2, q_ref, atol=1e-2, rtol=1e-2), "q2 mismatch vs reference"

    # TODO(synk): social_feature_encoder (None here) and training-mode aux_losses are
    # outside the fused-MLP fast path and are not implemented in the kernel.
    print("KERNEL_OK")
</pallas_src>

<mosaic_0001>
module attributes {stable_mosaic.version = 11 : i64} {
  func.func @_double_critic_kernel(%arg0: i32, %arg1: memref<8x32xf32, #tpu.memory_space<vmem>>, %arg2: memref<32x128xbf16, #tpu.memory_space<vmem>>, %arg3: memref<128x128xbf16, #tpu.memory_space<vmem>>, %arg4: memref<8x128xbf16, #tpu.memory_space<vmem>>, %arg5: memref<3x128xf32, #tpu.memory_space<vmem>>, %arg6: memref<1x1x8xf32, #tpu.memory_space<vmem>>) attributes {dimension_semantics = [#tpu.dimension_semantics<parallel>], iteration_bounds = array<i64: 1>, scalar_prefetch = 0 : i64, scratch_operands = 0 : i64, tpu.core_type = #tpu.core_type<tc>, window_params = [{transform_indices = @transform_0, window_bounds = array<i64: 8, 32>}, {pipeline_mode = #tpu.pipeline_mode<synchronous>, transform_indices = @transform_1, window_bounds = array<i64: 32, 128>}, {pipeline_mode = #tpu.pipeline_mode<synchronous>, transform_indices = @transform_2, window_bounds = array<i64: 128, 128>}, {pipeline_mode = #tpu.pipeline_mode<synchronous>, transform_indices = @transform_3, window_bounds = array<i64: 8, 128>}, {pipeline_mode = #tpu.pipeline_mode<synchronous>, transform_indices = @transform_4, window_bounds = array<i64: 3, 128>}, {transform_indices = @transform_5, window_bounds = array<i64: 1, 1, 8>}]} {
    %c0 = arith.constant 0 : index
    %c0_0 = arith.constant 0 : index
    %0 = vector.load %arg1[%c0, %c0_0] : memref<8x32xf32, #tpu.memory_space<vmem>>, vector<8x32xf32>
    %1 = arith.truncf %0 : vector<8x32xf32> to vector<8x32xbf16>
    %c0_1 = arith.constant 0 : index
    %c0_2 = arith.constant 0 : index
    %2 = vector.load %arg2[%c0_1, %c0_2] : memref<32x128xbf16, #tpu.memory_space<vmem>>, vector<32x128xbf16>
    %cst = arith.constant dense<0.000000e+00> : vector<8x128xf32>
    %3 = tpu.matmul %1, %2, %cst {dimension_numbers = #tpu.dot_dimension_numbers<[1], [0], [0], [1], [0, 0, 1, 1], [], []>} : vector<8x32xbf16>, vector<32x128xbf16>, vector<8x128xf32> -> vector<8x128xf32>
    %c0_3 = arith.constant 0 : index
    %c0_4 = arith.constant 0 : index
    %4 = vector.load %arg5[%c0_3, %c0_4] : memref<3x128xf32, #tpu.memory_space<vmem>>, vector<1x128xf32>
    %5 = vector.broadcast %4 : vector<1x128xf32> to vector<8x128xf32>
    %6 = arith.addf %3, %5 : vector<8x128xf32>
    %cst_5 = arith.constant 0.000000e+00 : f32
    %7 = vector.broadcast %cst_5 : f32 to vector<8x128xf32>
    %8 = arith.maximumf %6, %7 : vector<8x128xf32>
    %9 = arith.truncf %8 : vector<8x128xf32> to vector<8x128xbf16>
    %c0_6 = arith.constant 0 : index
    %c0_7 = arith.constant 0 : index
    %10 = vector.load %arg3[%c0_6, %c0_7] : memref<128x128xbf16, #tpu.memory_space<vmem>>, vector<128x128xbf16>
    %cst_8 = arith.constant dense<0.000000e+00> : vector<8x128xf32>
    %11 = tpu.matmul %9, %10, %cst_8 {dimension_numbers = #tpu.dot_dimension_numbers<[1], [0], [0], [1], [0, 0, 1, 1], [], []>} : vector<8x128xbf16>, vector<128x128xbf16>, vector<8x128xf32> -> vector<8x128xf32>
    %c1 = arith.constant 1 : index
    %c0_9 = arith.constant 0 : index
    %12 = vector.load %arg5[%c1, %c0_9] : memref<3x128xf32, #tpu.memory_space<vmem>>, vector<1x128xf32>
    %13 = vector.broadcast %12 : vector<1x128xf32> to vector<8x128xf32>
    %14 = arith.addf %11, %13 : vector<8x128xf32>
    %cst_10 = arith.constant 0.000000e+00 : f32
    %15 = vector.broadcast %cst_10 : f32 to vector<8x128xf32>
    %16 = arith.maximumf %14, %15 : vector<8x128xf32>
    %c0_11 = arith.constant 0 : index
    %c0_12 = arith.constant 0 : index
    %17 = vector.load %arg4[%c0_11, %c0_12] : memref<8x128xbf16, #tpu.memory_space<vmem>>, vector<8x128xbf16>
    %18 = arith.truncf %16 : vector<8x128xf32> to vector<8x128xbf16>
    %cst_13 = arith.constant dense<0.000000e+00> : vector<8x8xf32>
    %19 = tpu.matmul %17, %18, %cst_13 {dimension_numbers = #tpu.dot_dimension_numbers<[1], [1], [0], [0], [0, 0, 1, 0], [], []>} : vector<8x128xbf16>, vector<8x128xbf16>, vector<8x8xf32> -> vector<8x8xf32>
    %20 = vector.extract_strided_slice %19 {offsets = [0, 0], sizes = [1, 8], strides = [1, 1]} : vector<8x8xf32> to vector<1x8xf32>
    %c2 = arith.constant 2 : index
    %c0_14 = arith.constant 0 : index
    %21 = vector.load %arg5[%c2, %c0_14] : memref<3x128xf32, #tpu.memory_space<vmem>>, vector<1x1xf32>
    %22 = vector.broadcast %21 : vector<1x1xf32> to vector<1x8xf32>
    %23 = arith.addf %20, %22 : vector<1x8xf32>
    %24 = vector.shape_cast %23 : vector<1x8xf32> to vector<1x1x8xf32>
    %c0_15 = arith.constant 0 : index
    %c0_16 = arith.constant 0 : index
    %c0_17 = arith.constant 0 : index
    %25 = vector.load %arg6[%c0_15, %c0_16, %c0_17] : memref<1x1x8xf32, #tpu.memory_space<vmem>>, vector<1x1x8xf32>
    tpu.vector_store %arg6[%c0_15, %c0_16, %c0_17], %24 {strides = array<i32>} : memref<1x1x8xf32, #tpu.memory_space<vmem>>, vector<1x1x8xf32>,
    return
  }
  func.func @transform_0(%arg0: i32) -> (i32, i32) {
    %c0_i32 = arith.constant 0 : i32
    %c0_i32_0 = arith.constant 0 : i32
    return %arg0, %c0_i32 : i32, i32
  }
  func.func @transform_1(%arg0: i32) -> (i32, i32) {
    %c0_i32 = arith.constant 0 : i32
    %c0_i32_0 = arith.constant 0 : i32
    %c0_i32_1 = arith.constant 0 : i32
    return %c0_i32, %c0_i32_0 : i32, i32
  }
  func.func @transform_2(%arg0: i32) -> (i32, i32) {
    %c0_i32 = arith.constant 0 : i32
    %c0_i32_0 = arith.constant 0 : i32
    %c0_i32_1 = arith.constant 0 : i32
    return %c0_i32, %c0_i32_0 : i32, i32
  }
  func.func @transform_3(%arg0: i32) -> (i32, i32) {
    %c0_i32 = arith.constant 0 : i32
    %c0_i32_0 = arith.constant 0 : i32
    %c0_i32_1 = arith.constant 0 : i32
    return %c0_i32, %c0_i32_0 : i32, i32
  }
  func.func @transform_4(%arg0: i32) -> (i32, i32) {
    %c0_i32 = arith.constant 0 : i32
    %c0_i32_0 = arith.constant 0 : i32
    %c0_i32_1 = arith.constant 0 : i32
    return %c0_i32, %c0_i32_0 : i32, i32
  }
  func.func @transform_5(%arg0: i32) -> (i32, i32, i32) {
    %c0_i32 = arith.constant 0 : i32
    %c0_i32_0 = arith.constant 0 : i32
    %c0_i32_1 = arith.constant 0 : i32
    return %arg0, %c0_i32, %c0_i32_0 : i32, i32, i32
  }
}

</mosaic_0001>

<bundles_post_ra>
// kernel: tpu_custom_call.1
= control target key start
LH: loop header
LB: loop body
LE: loop exit
PB: predicated region body
PF: predicated region fallthrough
CT: control target
= control target key end

     0   :  { %10 = vsyncpa [#allocation3], 0  ;;  %s590_s0 = inlined_call_operand.hbm [shape: f32[8,32], index: 0, kind: input, shape index: {}]   ;;  %s591_s1 = inlined_call_operand.hbm [shape: bf16[32,128], index: 1, kind: input, shape index: {}]   ;;  %s592_s2 = inlined_call_operand.hbm [shape: bf16[128,128], index: 2, kind: input, shape index: {}]   ;;  %s593_s3 = inlined_call_operand.vmem [shape: bf16[8,128], index: 3, kind: input, shape index: {}]   ;;  %s594_s4 = inlined_call_operand.vmem [shape: f32[3,128], index: 4, kind: input, shape index: {}]   ;;  %s595_s5 = inlined_call_operand.hbm [shape: f32[1,1,8], index: 5, kind: output, shape index: {}]  }
   0x1   :  { %11 = vsyncpa [#allocation6], 0 }
   0x2   :  { %12 = vsyncpa [#allocation4], 0  ;;  %s482_s18 = smov [#allocation5]   ;;  %s388_s22 = scalar_lea.hbm %s591_s1, 256 }
   0x3   :  { %s28_s19 = sshll.u32 %s482_s18, 4  ;;  %p389_p0 = scmp.ne.s32.totalorder %s591_s1, %s388_s22  ;;  %s29_s19 = int_to_ptr.vmem [resolvable:$true] %s28_s19 }
   0x4   :  { %p392_p1 = scmp.lt.u32.totalorder %s388_s22, %s591_s1 }
   0x6   :  { %p394_p2 = pnand %p392_p1, %p389_p0 }
   0x8   :  { %397 = shalt.err (!%p394_p2)
}
   0x9   :  { %s398_s27 = scalar_lea.vmem %s29_s19, 256  ;;  %p403_p4 = scmp.lt.s32.totalorder %s29_s19, %s29_s19 }
   0xa   :  { %p399_p3 = scmp.ne.s32.totalorder %s29_s19, %s398_s27  ;;  %p404_p5 = scmp.lt.s32.totalorder %s398_s27, %s398_s27 }
   0xc   :  { %p405_p6 = por %p404_p5, %p403_p4 }
   0xe   :  { %p406_p7 = pnand %p405_p6, %p399_p3 }
  0x10   :  { %409 = shalt.err (!%p406_p7)
}
  0x11   :  { %s483_s28 = smov 64   ;;  %s484_s29 = smov 4  }
  0x12   :  { %34 = dma.hbm_to_vmem [thread:$0]  %s591_s1, 256, %s29_s19, [#allocation6], %s483_s28, %s483_s28, %s484_s29  }
  0x13   :  { %s485_s7 = smov [#allocation2]   ;;  %s486_s9 = smov [#allocation7]  }
  0x14   :  { %s19_s8 = sshll.u32 %s485_s7, 4  ;;  %s40_s10 = sshll.u32 %s486_s9, 4  ;;  %s20_s8 = int_to_ptr.vmem [resolvable:$true] %s19_s8  ;;  %s41_s10 = int_to_ptr.vmem [resolvable:$true] %s40_s10 }
  0x15   :  { %s410_s13 = scalar_lea.hbm %s590_s0, 128 }
  0x16   :  { %p411_p8 = scmp.ne.s32.totalorder %s590_s0, %s410_s13  ;;  %p414_p9 = scmp.lt.u32.totalorder %s410_s13, %s590_s0 }
  0x18   :  { %p416_p10 = pnand %p414_p9, %p411_p8 }
  0x1a   :  { %419 = shalt.err (!%p416_p10)
}
  0x1b   :  { %s420_s1 = scalar_lea.vmem %s20_s8, 128  ;;  %p425_p12 = scmp.lt.s32.totalorder %s20_s8, %s20_s8 }
  0x1c   :  { %p421_p11 = scmp.ne.s32.totalorder %s20_s8, %s420_s1  ;;  %p426_p13 = scmp.lt.s32.totalorder %s420_s1, %s420_s1 }
  0x1e   :  { %p427_p0 = por %p426_p13, %p425_p12 }
  0x20   :  { %p428_p1 = pnand %p427_p0, %p421_p11 }
  0x22   :  { %431 = shalt.err (!%p428_p1)
}
  0x23   :  { %22 = dma.hbm_to_vmem [thread:$0]  %s590_s0, 128, %s20_s8, [#allocation3]  }
  0x24   :  { %s432_s22 = scalar_lea.hbm %s592_s2, 1024 }
  0x25   :  { %p433_p2 = scmp.ne.s32.totalorder %s592_s2, %s432_s22  ;;  %p436_p3 = scmp.lt.u32.totalorder %s432_s22, %s592_s2 }
  0x27   :  { %p438_p4 = pnand %p436_p3, %p433_p2 }
  0x29   :  { %441 = shalt.err (!%p438_p4)
}
  0x2a   :  { %s442_s27 = scalar_lea.vmem %s41_s10, 1024  ;;  %p447_p6 = scmp.lt.s32.totalorder %s41_s10, %s41_s10 }
  0x2b   :  { %p443_p5 = scmp.ne.s32.totalorder %s41_s10, %s442_s27  ;;  %p448_p7 = scmp.lt.s32.totalorder %s442_s27, %s442_s27 }
  0x2d   :  { %p449_p8 = por %p448_p7, %p447_p6 }
  0x2f   :  { %p450_p9 = pnand %p449_p8, %p443_p5 }
  0x31   :  { %453 = shalt.err (!%p450_p9)
}
  0x32   :  { %46 = dma.hbm_to_vmem [thread:$0]  %s592_s2, 1024, %s41_s10, [#allocation6], %s483_s28, %s483_s28, %s484_s29  }
  0x33   :  { %476 = dma.done.wait [#allocation3], 128  }
  0x34   :  { %477 = vsyncadd [#allocation3], 4294967168 }
  0x35   :  { %478 = dma.done.wait [#allocation6], 1280  }
  0x36   :  { %479 = vsyncadd [#allocation6], 4294966016  ;;  %v487_v0 = vmov 0.0   ;;  %vm488_vm0 = vmmov 0   ;;  %v378_v1 = vld [vmem:[#allocation5] sm:$0xff]   ;;  %v379_v2 = vld [vmem:[#allocation5 + $0x8] sm:$0xff]  }
  0x37   :  { %334 = vmatprep.subr.bf16.mxu0 %v487_v0  ;;  %338 = vmatprep.mubr.msk.bf16.mxu0 %vm488_vm0, %v487_v0  ;;  %v61_v3 = vld [vmem:[#allocation2] sm:$0xff]  ;;  %v380_v4 = vld [vmem:[#allocation7] sm:$0xff]   ;;  %vm84_vm1 = vcmask 261120   ;;  %v382_v7 = vld [vmem:[#allocation7 + $0x10] sm:$0xff]   ;;  %v489_v22 = vmov 0   ;;  %s490_s11 = smov [#allocation8]  }
  0x38   :  { %342 = vmatprep.subr.bf16.mxu1 %v487_v0  ;;  %358 = vmatprep.mubr.msk.bf16.mxu1 %vm488_vm0, %v487_v0  ;;  %v62_v5 = vpack.c.bf16 %v61_v3, %v61_v3  ;;  %v381_v6 = vld [vmem:[#allocation7 + $0x8] sm:$0xff]   ;;  %v383_v8 = vld [vmem:[#allocation7 + $0x18] sm:$0xff]   ;;  %v384_v9 = vld [vmem:[#allocation7 + $0x20] sm:$0xff]   ;;  %s297_s12 = sshll.u32 %s490_s11, 4  ;;  %vm289_vm2 = vcmask 57344   ;;  %s298_s12 = int_to_ptr.vmem [resolvable:$true] %s297_s12 }
  0x39   :  { %335 = vmatpush3.bf16.msra.mxu0 %v378_v1  ;;  %343 = vmatpush3.bf16.msra.mxu1 %v380_v4  ;;  %v385_v10 = vld [vmem:[#allocation7 + $0x28] sm:$0xff]   ;;  %v386_v11 = vld [vmem:[#allocation7 + $0x30] sm:$0xff]   ;;  %v387_v12 = vld [vmem:[#allocation7 + $0x38] sm:$0xff]   ;;  %s458_s13 = scalar_lea.vmem %s298_s12, 32  ;;  %p459_p11 = scmp.lt.s32.totalorder %s298_s12, %s298_s12 }
  0x3a   :  { %336 = vmatprep.subr.bf16.mxu0 %v487_v0  ;;  %344 = vmatprep.subr.bf16.mxu1 %v487_v0  ;;  %v307_v13 = vld [vmem:[%s594_s4] ss:$0 sm:$0xff]  ;;  %v282_v21 = vld [vmem:[%s594_s4 + $0x2] sm:$0x1]  ;;  %v311_v23 = vld [vmem:[%s594_s4 + $0x1] ss:$0 sm:$0xff] }
  0x3b   :  { %377 = vset.pattern.permute.xlu0 %v489_v22  ;;  %v240_v31 = vld [vmem:[%s593_s3] sm:$0xf]  ;;  %s454_s4 = scalar_lea.vmem %s298_s12, 16 }
  0x3c   :  { %285 = vperm.xlu0 %377, %v282_v21   ;;  %p455_p10 = scmp.ne.s32.totalorder %s298_s12, %s454_s4  ;;  %p460_p12 = scmp.lt.s32.totalorder %s458_s13, %s454_s4 }
  0x3d   :  { %337 = vmatpush3.bf16.msra.mxu0 %v379_v2  ;;  %345 = vmatpush3.bf16.msra.mxu1 %v381_v6 }
  0x3e   :  { %362 = vmatprep.subr.bf16.mxu0 %v487_v0  ;;  %346 = vmatprep.subr.bf16.mxu1 %v487_v0  ;;  %p461_p13 = por %p460_p12, %p459_p11 }
  0x40   :  { %339 = vmatmul.mubr.msk.bf16.vlgmr.msra.gmra.mrb[0].mxu0 %vm84_vm1, %v62_v5  ;;  %p462_p0 = pnand %p461_p13, %p455_p10 }
  0x41   :  { %364 = vmatprep.mubr.msk.bf16.mxu0 %vm488_vm0, %v487_v0  ;;  %347 = vmatpush3.bf16.msra.mxu1 %v382_v7 }
  0x42   :  { %348 = vmatprep.subr.bf16.mxu1 %v487_v0 }
  0x45   :  { %349 = vmatpush3.bf16.msra.mxu1 %v383_v8 }
  0x46   :  { %350 = vmatprep.subr.bf16.mxu1 %v487_v0 }
  0x49   :  { %351 = vmatpush3.bf16.msra.mxu1 %v384_v9 }
  0x4a   :  { %352 = vmatprep.subr.bf16.mxu1 %v487_v0 }
  0x4d   :  { %353 = vmatpush3.bf16.msra.mxu1 %v385_v10 }
  0x4e   :  { %354 = vmatprep.subr.bf16.mxu1 %v487_v0 }
  0x51   :  { %355 = vmatpush3.bf16.msra.mxu1 %v386_v11 }
  0x52   :  { %356 = vmatprep.subr.bf16.mxu1 %v487_v0 }
  0x55   :  { %357 = vmatpush3.bf16.msra.mxu1 %v387_v12 }
  0xbb   :  { %v286_v32 = vpop.permute.xlu0 %285 }
 0x113   :  { %v122_v14 = vpop.f32.mrb[0].mxu0 }
 0x114   :  { %v123_v15 = vadd.f32 %v307_v13, %v122_v14  ;;  %v340_v16 = vpop.f32.mrb[1].mxu0 }
 0x115   :  { %v125_v17 = vpop.f32.mrb[2].mxu0 }
 0x116   :  { %v128_v18 = vmax.f32 %v123_v15, 0.0  ;;  %v341_v19 = vpop.f32.mrb[3].mxu0 }
 0x118   :  { %v129_v20 = vpack.c.bf16 %v128_v18, %v128_v18 }
 0x11a   :  { %359 = vmatmul.mubr.bf16.vlgmr.msra.gmra.mrb[0].mxu1 %v129_v20 }
 0x1ed   :  { %v233_v24 = vpop.f32.mrb[0].mxu1 }
 0x1ee   :  { %v234_v25 = vadd.f32 %v311_v23, %v233_v24  ;;  %v360_v26 = vpop.f32.mrb[1].mxu1 }
 0x1ef   :  { %v236_v27 = vpop.f32.mrb[2].mxu1 }
 0x1f0   :  { %v239_v28 = vmax.f32 %v234_v25, 0.0  ;;  %v361_v29 = vpop.f32.mrb[3].mxu1 }
 0x1f2   :  { %v241_v30 = vpack.c.bf16 %v239_v28, %v239_v28 }
 0x1f4   :  { %363 = vmatpush3.bf16.xpose.msra.mxu0 %v241_v30 }
 0x1fb   :  { %365 = vmatmul.mubr.bf16.vlgmr.msra.gmra.mrb[4].mxu0 %v240_v31 }
 0x2ce   :  { %v276_v33 = vpop.f32.mrb[4].mxu0 }
 0x2cf   :  { %v288_v34 = vadd.f32 %v286_v32, %v276_v33  ;;  %v366_v35 = vpop.f32.mrb[5].mxu0 }
 0x2d0   :  { %v279_v36 = vpop.f32.mrb[6].mxu0 }
 0x2d1   :  { %v367_v37 = vpop.f32.mrb[7].mxu0  ;;  %290 = vst.msk [vmem:[#allocation8] sm:$0x1] %vm289_vm2, %v288_v34 }
 0x2d2   :  { %465 = shalt.err (!%p462_p0)
}
 0x2d3   :  { %s466_s15 = scalar_lea.hbm %s595_s5, 16 }
 0x2d4   :  { %p467_p1 = scmp.ne.s32.totalorder %s595_s5, %s466_s15  ;;  %p470_p2 = scmp.lt.u32.totalorder %s466_s15, %s595_s5 }
 0x2d6   :  { %p472_p3 = pnand %p470_p2, %p467_p1 }
 0x2d8   :  { %475 = shalt.err (!%p472_p3)
}
 0x2d9   :  { %300 = dma.vmem_to_hbm [thread:$0]  %s298_s12, 16, %s595_s5, [#allocation4]  }
 0x2da   :  { %480 = dma.done.wait [#allocation4], 16  }
 0x2db   :  { %481 = vsyncadd [#allocation4], 4294967280 }
 0x2dc   :  { %304 = vsyncpa [#allocation3], 1 }
 0x2dd   :  { %305 = vsyncpa [#allocation6], 1 }
 0x2de   :  { %306 = vsyncpa [#allocation4], 1 }

</bundles_post_ra>
